<compile_context>
chip_gen: v7x
topology: tpu7x:2x2x1
jax: 0.10.0
libtpu: 0.0.40
codegen_flags: <defaults>
</compile_context>

<pallas_src>
import numpy as np
import jax
import jax.numpy as jnp
from jax.experimental import pallas as pl
from jax.experimental.pallas import tpu as pltpu

EPS = 1e-5
POOL_SIZES = (1, 2, 3, 6)               # AdaptiveAvgPool2d output sizes
NUM_POOL_ROWS = sum(s * s for s in POOL_SIZES)   # = 50


# ---------------------------------------------------------------------------
# Pallas kernels
# ---------------------------------------------------------------------------
def _pool_conv_kernel(x_ref, p_ref, w_ref, s_ref, b_ref, m_ref, o_ref, acc_ref):
    """acc += P_blk @ x_blk; on the last K step apply fused 1x1 conv + BN + ReLU + mask."""
    k = pl.program_id(1)

    @pl.when(k == 0)
    def _init():
        acc_ref[...] = jnp.zeros_like(acc_ref)

    acc_ref[...] += jnp.dot(p_ref[...], x_ref[0],
                            preferred_element_type=jnp.float32)

    @pl.when(k == pl.num_programs(1) - 1)
    def _finalize():
        y = jnp.dot(acc_ref[...], w_ref[...],
                    preferred_element_type=jnp.float32)        # (50, 4*C4)
        y = jnp.maximum(y * s_ref[...] + b_ref[...], 0.0) * m_ref[...]
        o_ref[0] = y.astype(o_ref.dtype)


def _upsample_concat_kernel(x_ref, k_ref, y_ref, o_ref):
    """out tile = [x tile | bilinear-upsampled branch features], one lane-dense store."""
    up = jnp.dot(k_ref[...], y_ref[0], preferred_element_type=jnp.float32)  # (tb, C)
    o_ref[0] = jnp.concatenate(
        [x_ref[0].astype(jnp.float32), up], axis=-1).astype(o_ref.dtype)


# ---------------------------------------------------------------------------
# Tile-size heuristics (VMEM-aware, (8,128)-legal)
# ---------------------------------------------------------------------------
def _pick_reduction_tile(hw, c):
    # K-dim tile for the pooling matmul: multiple of 128 (lane constraint on the
    # pool-matrix block), >=2 steps when possible, modest double-buffered footprint.
    for cand in (2048, 1024, 512, 256, 128):
        if hw % cand == 0 and hw // cand >= 2 and cand * c * 4 <= (4 << 20):
            return cand
    return hw     # fall back to a single full-length reduction step


def _pick_row_tile(hw, c_out):
    # Output-row tile for the upsample+concat kernel: multiple of 8, >=2 tiles when
    # possible, modest VMEM footprint (x tile + out tile + upsample-matrix tile).
    for cand in (4096, 2048, 1024, 512, 256, 128, 64, 32, 16, 8):
        if hw % cand == 0 and hw // cand >= 2 and cand * c_out * 4 * 3 <= (12 << 20):
            return cand
    return hw


# ---------------------------------------------------------------------------
# pallas_call wrappers
# ---------------------------------------------------------------------------
def pool_conv(x_flat, pool_mat, w_cat, scale, bias, mask):
    # x_flat: (N, H*W, C); pool_mat: (50, H*W); w_cat: (C, 4*C4); mask: (50, 4*C4)
    N, HW, C = x_flat.shape
    R = pool_mat.shape[0]
    Ccat = w_cat.shape[1]
    tk = _pick_reduction_tile(HW, C)
    nk = HW // tk
    return pl.pallas_call(
        _pool_conv_kernel,
        out_shape=jax.ShapeDtypeStruct((N, R, Ccat), jnp.float32),
        grid=(N, nk),
        in_specs=[
            pl.BlockSpec((1, tk, C), lambda n, k: (n, k, 0)),
            pl.BlockSpec((R, tk), lambda n, k: (0, k)),
            pl.BlockSpec((C, Ccat), lambda n, k: (0, 0)),
            pl.BlockSpec((1, Ccat), lambda n, k: (0, 0)),
            pl.BlockSpec((1, Ccat), lambda n, k: (0, 0)),
            pl.BlockSpec((R, Ccat), lambda n, k: (0, 0)),
        ],
        out_specs=pl.BlockSpec((1, R, Ccat), lambda n, k: (n, 0, 0)),
        scratch_shapes=[pltpu.VMEM((R, C), jnp.float32)],
        compiler_params=pltpu.CompilerParams(
            dimension_semantics=("parallel", "arbitrary")),
    )(x_flat, pool_mat, w_cat, scale.reshape(1, Ccat), bias.reshape(1, Ccat), mask)


def upsample_concat(x_flat, up_mat, y):
    # x_flat: (N, H*W, C); up_mat: (H*W, 50); y: (N, 50, C) block-diagonal branch feats.
    N, HW, C = x_flat.shape
    R = up_mat.shape[1]
    Ccat = y.shape[2]
    tb = _pick_row_tile(HW, C + Ccat)
    nt = HW // tb
    return pl.pallas_call(
        _upsample_concat_kernel,
        out_shape=jax.ShapeDtypeStruct((N, HW, C + Ccat), jnp.float32),
        grid=(N, nt),
        in_specs=[
            pl.BlockSpec((1, tb, C), lambda n, t: (n, t, 0)),
            pl.BlockSpec((tb, R), lambda n, t: (t, 0)),
            pl.BlockSpec((1, R, Ccat), lambda n, t: (n, 0, 0)),
        ],
        out_specs=pl.BlockSpec((1, tb, C + Ccat), lambda n, t: (n, t, 0)),
        compiler_params=pltpu.CompilerParams(
            dimension_semantics=("parallel", "parallel")),
    )(x_flat, up_mat, y)


# ---------------------------------------------------------------------------
# Constant linear operators (built with numpy at trace time)
# ---------------------------------------------------------------------------
def _adaptive_pool_matrix(out_size, in_size):
    # PyTorch AdaptiveAvgPool bins: start = floor(i*L/s), end = ceil((i+1)*L/s).
    m = np.zeros((out_size, in_size), np.float32)
    for o in range(out_size):
        start = (o * in_size) // out_size
        end = -(-((o + 1) * in_size) // out_size)
        m[o, start:end] = 1.0 / (end - start)
    return m


def _upsample_matrix(out_size, in_size):
    # Bilinear interpolation weights, align_corners=True (PyTorch semantics).
    m = np.zeros((out_size, in_size), np.float32)
    if in_size == 1:
        m[:, 0] = 1.0
        return m
    scale = (in_size - 1) / (out_size - 1) if out_size > 1 else 0.0
    for o in range(out_size):
        src = o * scale
        i0 = min(int(np.floor(src)), in_size - 1)
        i1 = min(i0 + 1, in_size - 1)
        f = src - i0
        m[o, i0] += 1.0 - f
        m[o, i1] += f
    return m


def _build_constants(H, W, C):
    C4 = C // 4
    pool_blocks, up_blocks = [], []
    mask = np.zeros((NUM_POOL_ROWS, 4 * C4), np.float32)
    r0 = 0
    for b, s in enumerate(POOL_SIZES):
        pool_blocks.append(np.kron(_adaptive_pool_matrix(s, H),
                                   _adaptive_pool_matrix(s, W)))      # (s*s, H*W)
        up_blocks.append(np.kron(_upsample_matrix(H, s),
                                 _upsample_matrix(W, s)))             # (H*W, s*s)
        mask[r0:r0 + s * s, b * C4:(b + 1) * C4] = 1.0
        r0 += s * s
    P = np.concatenate(pool_blocks, axis=0)                           # (50, H*W)
    K = np.concatenate(up_blocks, axis=1)                             # (H*W, 50)
    return jnp.asarray(P), jnp.asarray(K), jnp.asarray(mask)


# ---------------------------------------------------------------------------
# Parameters (deterministic synthetic init; BN folded into scale/bias)
# ---------------------------------------------------------------------------
def _bn_fold(key, c):
    k1, k2, k3, k4 = jax.random.split(key, 4)
    gamma = 1.0 + 0.1 * jax.random.normal(k1, (c,), jnp.float32)
    beta = 0.1 * jax.random.normal(k2, (c,), jnp.float32)
    mean = 0.1 * jax.random.normal(k3, (c,), jnp.float32)
    var = 1.0 + 0.1 * jnp.abs(jax.random.normal(k4, (c,), jnp.float32))
    scale = gamma / jnp.sqrt(var + EPS)
    bias = beta - mean * scale
    return scale, bias


def init_pyramid_pooling_params(key, in_channels):
    C4 = in_channels // 4
    keys = jax.random.split(key, 8)
    ws, scales, biases = [], [], []
    for b in range(4):
        w = 0.1 * jax.random.normal(keys[2 * b], (in_channels, C4), jnp.float32)
        s, bb = _bn_fold(keys[2 * b + 1], C4)
        ws.append(w); scales.append(s); biases.append(bb)
    return dict(w=jnp.concatenate(ws, axis=1),        # (C, 4*C4)
                scale=jnp.concatenate(scales),        # (4*C4,)
                bias=jnp.concatenate(biases))         # (4*C4,)


# ---------------------------------------------------------------------------
# Forward
# ---------------------------------------------------------------------------
def pyramid_pooling_forward(params, x_nchw):
    N, C, H, W = x_nchw.shape
    assert C % 4 == 0
    P, K, mask = _build_constants(H, W, C)
    x_flat = jnp.transpose(x_nchw, (0, 2, 3, 1)).reshape(N, H * W, C)
    y = pool_conv(x_flat, P, params["w"], params["scale"], params["bias"], mask)
    out_flat = upsample_concat(x_flat, K, y)                 # (N, H*W, 2C)
    out = out_flat.reshape(N, H, W, 2 * C)
    return jnp.transpose(out, (0, 3, 1, 2))                  # NCHW


# Pure-JAX reference (independent composition of the same linear operators)
def _reference_forward(params, x_nchw):
    N, C, H, W = x_nchw.shape
    C4 = C // 4
    x_nhwc = jnp.transpose(x_nchw, (0, 2, 3, 1))
    x_flat = x_nhwc.reshape(N, H * W, C)
    feats = [x_nhwc]
    for b, s in enumerate(POOL_SIZES):
        Pb = jnp.asarray(np.kron(_adaptive_pool_matrix(s, H),
                                 _adaptive_pool_matrix(s, W)))
        pooled = jnp.einsum("rk,nkc->nrc", Pb, x_flat)                 # (N, s*s, C)
        wb = params["w"][:, b * C4:(b + 1) * C4]
        sb = params["scale"][b * C4:(b + 1) * C4]
        bb = params["bias"][b * C4:(b + 1) * C4]
        yb = jnp.maximum(pooled @ wb * sb + bb, 0.0)                   # (N, s*s, C4)
        Kb = jnp.asarray(np.kron(_upsample_matrix(H, s),
                                 _upsample_matrix(W, s)))
        up = jnp.einsum("pr,nrc->npc", Kb, yb).reshape(N, H, W, C4)
        feats.append(up)
    return jnp.transpose(jnp.concatenate(feats, axis=-1), (0, 3, 1, 2))


if __name__ == "__main__":
    key = jax.random.PRNGKey(0)
    kp, kx = jax.random.split(key)
    N, C, H, W = 2, 16, 16, 16
    params = init_pyramid_pooling_params(kp, C)
    x = jax.random.normal(kx, (N, C, H, W), jnp.float32)

    fwd = jax.jit(pyramid_pooling_forward)
    out = jax.block_until_ready(fwd(params, x))

    assert out.shape == (N, 2 * C, H, W), out.shape
    assert bool(jnp.isfinite(out).all())
    # first C output channels are the identity pass-through of x
    assert bool(jnp.allclose(out[:, :C], x, atol=1e-5))
    # full numerical check against the pure-JAX reference
    ref = _reference_forward(params, x)
    assert bool(jnp.allclose(out, ref, atol=1e-2, rtol=1e-2))
    print("KERNEL_OK")
</pallas_src>

<mosaic_0001>
module attributes {stable_mosaic.version = 11 : i64} {
  func.func @_upsample_concat_kernel(%arg0: i32, %arg1: i32, %arg2: memref<1x128x16xf32, #tpu.memory_space<vmem>>, %arg3: memref<128x50xf32, #tpu.memory_space<vmem>>, %arg4: memref<1x50x16xf32, #tpu.memory_space<vmem>>, %arg5: memref<1x128x32xf32, #tpu.memory_space<vmem>>) attributes {dimension_semantics = [#tpu.dimension_semantics<parallel>, #tpu.dimension_semantics<parallel>], iteration_bounds = array<i64: 2, 2>, scalar_prefetch = 0 : i64, scratch_operands = 0 : i64, tpu.core_type = #tpu.core_type<tc>, window_params = [{transform_indices = @transform_0, window_bounds = array<i64: 1, 128, 16>}, {transform_indices = @transform_1, window_bounds = array<i64: 128, 50>}, {transform_indices = @transform_2, window_bounds = array<i64: 1, 50, 16>}, {transform_indices = @transform_3, window_bounds = array<i64: 1, 128, 32>}]} {
    %c0 = arith.constant 0 : index
    %c0_0 = arith.constant 0 : index
    %0 = vector.load %arg3[%c0, %c0_0] : memref<128x50xf32, #tpu.memory_space<vmem>>, vector<128x50xf32>
    %c0_1 = arith.constant 0 : index
    %c0_2 = arith.constant 0 : index
    %c0_3 = arith.constant 0 : index
    %1 = vector.load %arg4[%c0_1, %c0_2, %c0_3] : memref<1x50x16xf32, #tpu.memory_space<vmem>>, vector<1x50x16xf32>
    %2 = vector.shape_cast %1 : vector<1x50x16xf32> to vector<50x16xf32>
    %cst = arith.constant dense<0.000000e+00> : vector<128x16xf32>
    %3 = tpu.matmul %0, %2, %cst {dimension_numbers = #tpu.dot_dimension_numbers<[1], [0], [0], [1], [0, 0, 1, 1], [], []>} : vector<128x50xf32>, vector<50x16xf32>, vector<128x16xf32> -> vector<128x16xf32>
    %c0_4 = arith.constant 0 : index
    %c0_5 = arith.constant 0 : index
    %c0_6 = arith.constant 0 : index
    %4 = vector.load %arg2[%c0_4, %c0_5, %c0_6] : memref<1x128x16xf32, #tpu.memory_space<vmem>>, vector<1x128x16xf32>
    %5 = vector.shape_cast %4 : vector<1x128x16xf32> to vector<128x16xf32>
    %6 = tpu.concatenate %5, %3 in 1 : vector<128x16xf32>, vector<128x16xf32> -> vector<128x32xf32>
    %c0_7 = arith.constant 0 : index
    %c0_8 = arith.constant 0 : index
    %c0_9 = arith.constant 0 : index
    %7 = vector.load %arg5[%c0_7, %c0_8, %c0_9] : memref<1x128x32xf32, #tpu.memory_space<vmem>>, vector<1x128x32xf32>
    %8 = vector.shape_cast %7 : vector<1x128x32xf32> to vector<128x32xf32>
    %9 = vector.shape_cast %6 : vector<128x32xf32> to vector<1x128x32xf32>
    tpu.vector_store %arg5[%c0_7, %c0_8, %c0_9], %9 {strides = array<i32>} : memref<1x128x32xf32, #tpu.memory_space<vmem>>, vector<1x128x32xf32>,
    return
  }
  func.func @transform_0(%arg0: i32, %arg1: i32) -> (i32, i32, i32) {
    %c0_i32 = arith.constant 0 : i32
    %c0_i32_0 = arith.constant 0 : i32
    return %arg0, %arg1, %c0_i32 : i32, i32, i32
  }
  func.func @transform_1(%arg0: i32, %arg1: i32) -> (i32, i32) {
    %c0_i32 = arith.constant 0 : i32
    %c0_i32_0 = arith.constant 0 : i32
    return %arg1, %c0_i32 : i32, i32
  }
  func.func @transform_2(%arg0: i32, %arg1: i32) -> (i32, i32, i32) {
    %c0_i32 = arith.constant 0 : i32
    %c0_i32_0 = arith.constant 0 : i32
    %c0_i32_1 = arith.constant 0 : i32
    return %arg0, %c0_i32, %c0_i32_0 : i32, i32, i32
  }
  func.func @transform_3(%arg0: i32, %arg1: i32) -> (i32, i32, i32) {
    %c0_i32 = arith.constant 0 : i32
    %c0_i32_0 = arith.constant 0 : i32
    return %arg0, %arg1, %c0_i32 : i32, i32, i32
  }
}

module attributes {stable_mosaic.version = 11 : i64} {
  func.func @_pool_conv_kernel(%arg0: i32, %arg1: i32, %arg2: memref<1x128x16xf32, #tpu.memory_space<vmem>>, %arg3: memref<50x128xf32, #tpu.memory_space<vmem>>, %arg4: memref<16x16xf32, #tpu.memory_space<vmem>>, %arg5: memref<1x16xf32, #tpu.memory_space<vmem>>, %arg6: memref<1x16xf32, #tpu.memory_space<vmem>>, %arg7: memref<50x16xf32, #tpu.memory_space<vmem>>, %arg8: memref<1x50x16xf32, #tpu.memory_space<vmem>>, %arg9: memref<50x16xf32, #tpu.memory_space<vmem>>) attributes {dimension_semantics = [#tpu.dimension_semantics<parallel>, #tpu.dimension_semantics<arbitrary>], iteration_bounds = array<i64: 2, 2>, scalar_prefetch = 0 : i64, scratch_operands = 1 : i64, tpu.core_type = #tpu.core_type<tc>, window_params = [{transform_indices = @transform_0, window_bounds = array<i64: 1, 128, 16>}, {transform_indices = @transform_1, window_bounds = array<i64: 50, 128>}, {pipeline_mode = #tpu.pipeline_mode<synchronous>, transform_indices = @transform_2, window_bounds = array<i64: 16, 16>}, {pipeline_mode = #tpu.pipeline_mode<synchronous>, transform_indices = @transform_3, window_bounds = array<i64: 1, 16>}, {pipeline_mode = #tpu.pipeline_mode<synchronous>, transform_indices = @transform_4, window_bounds = array<i64: 1, 16>}, {pipeline_mode = #tpu.pipeline_mode<synchronous>, transform_indices = @transform_5, window_bounds = array<i64: 50, 16>}, {transform_indices = @transform_6, window_bounds = array<i64: 1, 50, 16>}]} {
    %c0_i32 = arith.constant 0 : i32
    %0 = arith.cmpi eq, %arg1, %c0_i32 : i32
    %1 = arith.extui %0 : i1 to i32
    %c0_i32_0 = arith.constant 0 : i32
    %2 = arith.cmpi ne, %1, %c0_i32_0 : i32
    scf.if %2 {
      %cst_10 = arith.constant 0.000000e+00 : f32
      %13 = vector.broadcast %cst_10 : f32 to vector<50x16xf32>
      %c0_11 = arith.constant 0 : index
      %c0_12 = arith.constant 0 : index
      %14 = vector.load %arg9[%c0_11, %c0_12] : memref<50x16xf32, #tpu.memory_space<vmem>>, vector<50x16xf32>
      tpu.vector_store %arg9[%c0_11, %c0_12], %13 {strides = array<i32>} : memref<50x16xf32, #tpu.memory_space<vmem>>, vector<50x16xf32>,
    } else {
    }
    %c0 = arith.constant 0 : index
    %c0_1 = arith.constant 0 : index
    %3 = vector.load %arg9[%c0, %c0_1] : memref<50x16xf32, #tpu.memory_space<vmem>>, vector<50x16xf32>
    %c0_2 = arith.constant 0 : index
    %c0_3 = arith.constant 0 : index
    %4 = vector.load %arg3[%c0_2, %c0_3] : memref<50x128xf32, #tpu.memory_space<vmem>>, vector<50x128xf32>
    %c0_4 = arith.constant 0 : index
    %c0_5 = arith.constant 0 : index
    %c0_6 = arith.constant 0 : index
    %5 = vector.load %arg2[%c0_4, %c0_5, %c0_6] : memref<1x128x16xf32, #tpu.memory_space<vmem>>, vector<1x128x16xf32>
    %6 = vector.shape_cast %5 : vector<1x128x16xf32> to vector<128x16xf32>
    %cst = arith.constant dense<0.000000e+00> : vector<50x16xf32>
    %7 = tpu.matmul %4, %6, %cst {dimension_numbers = #tpu.dot_dimension_numbers<[1], [0], [0], [1], [0, 0, 1, 1], [], []>} : vector<50x128xf32>, vector<128x16xf32>, vector<50x16xf32> -> vector<50x16xf32>
    %8 = arith.addf %3, %7 : vector<50x16xf32>
    %c0_7 = arith.constant 0 : index
    %c0_8 = arith.constant 0 : index
    %9 = vector.load %arg9[%c0_7, %c0_8] : memref<50x16xf32, #tpu.memory_space<vmem>>, vector<50x16xf32>
    tpu.vector_store %arg9[%c0_7, %c0_8], %8 {strides = array<i32>} : memref<50x16xf32, #tpu.memory_space<vmem>>, vector<50x16xf32>,
    %c1_i32 = arith.constant 1 : i32
    %10 = arith.cmpi eq, %arg1, %c1_i32 : i32
    %11 = arith.extui %10 : i1 to i32
    %c0_i32_9 = arith.constant 0 : i32
    %12 = arith.cmpi ne, %11, %c0_i32_9 : i32
    scf.if %12 {
      %c0_10 = arith.constant 0 : index
      %c0_11 = arith.constant 0 : index
      %13 = vector.load %arg9[%c0_10, %c0_11] : memref<50x16xf32, #tpu.memory_space<vmem>>, vector<50x16xf32>
      %c0_12 = arith.constant 0 : index
      %c0_13 = arith.constant 0 : index
      %14 = vector.load %arg4[%c0_12, %c0_13] : memref<16x16xf32, #tpu.memory_space<vmem>>, vector<16x16xf32>
      %cst_14 = arith.constant dense<0.000000e+00> : vector<50x16xf32>
      %15 = tpu.matmul %13, %14, %cst_14 {dimension_numbers = #tpu.dot_dimension_numbers<[1], [0], [0], [1], [0, 0, 1, 1], [], []>} : vector<50x16xf32>, vector<16x16xf32>, vector<50x16xf32> -> vector<50x16xf32>
      %c0_15 = arith.constant 0 : index
      %c0_16 = arith.constant 0 : index
      %16 = vector.load %arg5[%c0_15, %c0_16] : memref<1x16xf32, #tpu.memory_space<vmem>>, vector<1x16xf32>
      %17 = vector.broadcast %16 : vector<1x16xf32> to vector<50x16xf32>
      %18 = arith.mulf %15, %17 : vector<50x16xf32>
      %c0_17 = arith.constant 0 : index
      %c0_18 = arith.constant 0 : index
      %19 = vector.load %arg6[%c0_17, %c0_18] : memref<1x16xf32, #tpu.memory_space<vmem>>, vector<1x16xf32>
      %20 = vector.broadcast %19 : vector<1x16xf32> to vector<50x16xf32>
      %21 = arith.addf %18, %20 : vector<50x16xf32>
      %cst_19 = arith.constant 0.000000e+00 : f32
      %22 = vector.broadcast %cst_19 : f32 to vector<50x16xf32>
      %23 = arith.maximumf %21, %22 : vector<50x16xf32>
      %c0_20 = arith.constant 0 : index
      %c0_21 = arith.constant 0 : index
      %24 = vector.load %arg7[%c0_20, %c0_21] : memref<50x16xf32, #tpu.memory_space<vmem>>, vector<50x16xf32>
      %25 = arith.mulf %23, %24 : vector<50x16xf32>
      %c0_22 = arith.constant 0 : index
      %c0_23 = arith.constant 0 : index
      %c0_24 = arith.constant 0 : index
      %26 = vector.load %arg8[%c0_22, %c0_23, %c0_24] : memref<1x50x16xf32, #tpu.memory_space<vmem>>, vector<1x50x16xf32>
      %27 = vector.shape_cast %26 : vector<1x50x16xf32> to vector<50x16xf32>
      %28 = vector.shape_cast %25 : vector<50x16xf32> to vector<1x50x16xf32>
      tpu.vector_store %arg8[%c0_22, %c0_23, %c0_24], %28 {strides = array<i32>} : memref<1x50x16xf32, #tpu.memory_space<vmem>>, vector<1x50x16xf32>,
    } else {
    }
    return
  }
  func.func @transform_0(%arg0: i32, %arg1: i32) -> (i32, i32, i32) {
    %c0_i32 = arith.constant 0 : i32
    %c0_i32_0 = arith.constant 0 : i32
    return %arg0, %arg1, %c0_i32 : i32, i32, i32
  }
  func.func @transform_1(%arg0: i32, %arg1: i32) -> (i32, i32) {
    %c0_i32 = arith.constant 0 : i32
    %c0_i32_0 = arith.constant 0 : i32
    return %c0_i32, %arg1 : i32, i32
  }
  func.func @transform_2(%arg0: i32, %arg1: i32) -> (i32, i32) {
    %c0_i32 = arith.constant 0 : i32
    %c0_i32_0 = arith.constant 0 : i32
    %c0_i32_1 = arith.constant 0 : i32
    return %c0_i32, %c0_i32_0 : i32, i32
  }
  func.func @transform_3(%arg0: i32, %arg1: i32) -> (i32, i32) {
    %c0_i32 = arith.constant 0 : i32
    %c0_i32_0 = arith.constant 0 : i32
    %c0_i32_1 = arith.constant 0 : i32
    return %c0_i32, %c0_i32_0 : i32, i32
  }
  func.func @transform_4(%arg0: i32, %arg1: i32) -> (i32, i32) {
    %c0_i32 = arith.constant 0 : i32
    %c0_i32_0 = arith.constant 0 : i32
    %c0_i32_1 = arith.constant 0 : i32
    return %c0_i32, %c0_i32_0 : i32, i32
  }
  func.func @transform_5(%arg0: i32, %arg1: i32) -> (i32, i32) {
    %c0_i32 = arith.constant 0 : i32
    %c0_i32_0 = arith.constant 0 : i32
    %c0_i32_1 = arith.constant 0 : i32
    return %c0_i32, %c0_i32_0 : i32, i32
  }
  func.func @transform_6(%arg0: i32, %arg1: i32) -> (i32, i32, i32) {
    %c0_i32 = arith.constant 0 : i32
    %c0_i32_0 = arith.constant 0 : i32
    %c0_i32_1 = arith.constant 0 : i32
    return %arg0, %c0_i32, %c0_i32_0 : i32, i32, i32
  }
}

</mosaic_0001>

<bundles_post_ra>
// kernel: pyramid_pooling_forward.3
= control target key start
LH: loop header
LB: loop body
LE: loop exit
PB: predicated region body
PF: predicated region fallthrough
CT: control target
= control target key end

     0   :  { %8 = vsyncpa [#allocation3], 0  ;;  %s1269_s0 = inlined_call_operand.vmem [shape: f32[2,256,16], index: 0, kind: input, shape index: {}]   ;;  %s1270_s1 = inlined_call_operand.vmem [shape: f32[256,50], index: 1, kind: input, shape index: {}]   ;;  %s1271_s2 = inlined_call_operand.vmem [shape: f32[2,50,16], index: 2, kind: input, shape index: {}]   ;;  %s1272_s3 = inlined_call_operand.hbm [shape: f32[2,256,32], index: 3, kind: output, shape index: {}]  }
   0x1   :  { %10 = vsyncpa [#allocation3 + $0x1], 0  ;;  %s1010_s12 = smov 0   ;;  %s1012_s13 = smov 0  }
   0x2   :  { %s1014_s14 = smov 0   ;;  %s1016_s15 = smov 0  }
   0x3   :  { %s1018_s16 = smov 0   ;;  %s1020_s17 = smov 0  }
   0x4   :  { %s1022_s18 = smov 0   ;;  %s1024_s19 = smov 0  }
   0x5 LB: > { %s699_s20 = sadd.s32 4294967295, %s984_s19   ;;  %s700_s21 = sadd.s32 4294967294, %s984_s19   ;;  %s984_s19 = sphi %s1024_s19, %s16_s19   ;;  %s980_s18 = sphi %s1022_s18, %s1281_s18   ;;  %s976_s17 = sphi %s1020_s17, %s1280_s17   ;;  %s972_s16 = sphi %s1018_s16, %s1279_s16   ;;  %s968_s15 = sphi %s1016_s15, %s1278_s15   ;;  %s964_s14 = sphi %s1014_s14, %s1277_s14   ;;  %s960_s13 = sphi %s1012_s13, %s1276_s13   ;;  %s956_s12 = sphi %s1010_s12, %s1275_s12  }
   0x6   : > { %s25_s22 = sadd.s32 1, %s976_s17  ;;  %s28_s23 = sadd.s32 1, %s980_s18 }
   0x7   : > { %p26_p0 = scmp.ge.s32.totalorder %s25_s22, 2  ;;  %p127_p1 = scmp.ne.s32.totalorder %s964_s14, %s960_s13 }
   0x8   : > { %p128_p2 = scmp.eq.s32.totalorder %s699_s20, 3  ;;  %p133_p5 = scmp.ne.s32.totalorder %s960_s13, %s956_s12 }
   0x9   : > { %s1283_s22 = smov (%p26_p0, %s25_s22), 0  ;;  %s1285_s23 = smov (!%p26_p0, %s28_s23), %s980_s18 }
   0xa   : > { %s113_s24 = ssub.s32 %s976_s17, %s1283_s22  ;;  %p1061_p3 = por %p128_p2, %p127_p1 }
   0xb   : > { %p30_p4 = scmp.ge.s32.totalorder %s1285_s23, 2  ;;  %p134_p6 = scmp.eq.s32.totalorder %s700_s21, 3 }
   0xc   : > { %p703_p7 = scmp.ge.s32.totalorder %s984_s19, 1  ;;  %p182_p9 = scmp.lt.s32.totalorder %s984_s19, 5 }
   0xd   : > { %s1287_s23 = smov (%p30_p4, %s1285_s23), 0  ;;  %p1070_p8 = por %p134_p6, %p133_p5 }
   0xe   : > { %s112_s27 = ssub.s32 %s980_s18, %s1287_s23  ;;  %s117_s28 = sadd.s32 1, %s964_s14 }
   0xf   : > { %s114_s29 = sor.u32 %s113_s24, %s112_s27  ;;  %p183_p10 = pnand %p703_p7, %p182_p9 }
  0x10   : > { %p115_p11 = scmp.eq.s32.totalorder %s114_s29, 0  ;;  %s1082_s4 = sshll.u32 (!%p183_p10), %s968_s15, 4  ;;  %vm265_vm0 = vcmask (!%p183_p10), 408576   ;;  %vm314_vm1 = vcmask (!%p183_p10), 1041408   ;;  %vm543_vm2 = vcmask (!%p183_p10), 130048   ;;  %vm560_vm3 = vcmask (!%p183_p10), 261120  }
  0x11   : > { %186 = sbr.rel (%p183_p10) target bundleno = 419 (0x1a3), region = 32  ;;  %p221_p12 = scmp.lt.s32.totalorder (!%p183_p10), %s972_s16, 1 }
  0x12   : > { %s1079_s30 = scalar_select %p115_p11, %s964_s14, %s117_s28  }
  0x13   : > { %p223_p13 = scmp.lt.s32.totalorder (!%p183_p10), %s1082_s4, 31  ;;  %s986_s28 = smov (!%p183_p10), 16  }
  0x14   : > { %s730_s11 = sshll.u32 (!%p183_p10), %s972_s16, 5 }
  0x15   : > { %s590_s20 = sadd.s32 (!%p183_p10), %s730_s11, %s1082_s4 }
  0x18   : > { %s222_s5 = scalar_select %p221_p12, %s972_s16, 1 }
  0x19   : > { %s224_s6 = scalar_select %p223_p13, %s1082_s4, 31 }
  0x1a   : > { %s706_s7 = sshll.u32 %s222_s5, 5  ;;  %s815_s8 = smul.u32 56, %s222_s5 }
  0x1b   : > { %s1088_s9 = sadd.s32 %s706_s7, %s224_s6  ;;  %s709_s10 = sshll.u32 %s224_s6, 3 }
  0x1c   : > { %s1093_s21 = scalar_lea.vmem %s1270_s1, %s709_s10  ;;  %s240_s27 = scalar_lea.vmem %s1271_s2, %s815_s8 }
  0x1d   : > { %v242_v0 = vld [vmem:[%s1093_s21] sm:$0xff]  ;;  %v259_v3 = vld [vmem:[%s240_s27 + $0x8] sm:$0xff]  ;;  %v260_v4 = vld [vmem:[%s240_s27 + $0x10] sm:$0xff]  ;;  %s707_s29 = sshll.u32 %s1088_s9, 3  ;;  %s217_s5 = sand.u32 1, %s960_s13  }
  0x1e   : > { %v250_v1 = vld [vmem:[%s1093_s21 + $0x40] sm:$0xff]  ;;  %771 = vmatprep.mubr.msk.f32.mxu0 %vm265_vm0, %v242_v0  ;;  %v261_v6 = vld [vmem:[%s240_s27 + $0x18] sm:$0xff]  ;;  %v263_v9 = vld [vmem:[%s240_s27 + $0x28] sm:$0xff]  ;;  %s1135_s8 = scalar_lea.vmem %s1269_s0, %s707_s29  ;;  %s704_s10 = sshll.u32 %s217_s5, 7 }
  0x1f   : > { %v258_v2 = vld [vmem:[%s240_s27] sm:$0xff]  ;;  %783 = vmatprep.mubr.msk.f32.mxu1 %vm265_vm0, %v250_v1  ;;  %v799_v7 = vpack.c.bf16 %v261_v6, %v260_v4  ;;  %v264_v11 = vld [vmem:[%s240_s27 + $0x30] sm:$0x3]  ;;  %v243_v12 = vld [vmem:[%s1093_s21 + $0x8] sm:$0xff]  ;;  %s1143_s9 = scalar_lea.vmem [#allocation2], %s704_s10  ;;  %s731_s16 = sshll.u32 %s590_s20, 7 }
  0x20   : > { %v795_v5 = vpack.c.bf16 %v259_v3, %v258_v2  ;;  %v262_v8 = vld [vmem:[%s240_s27 + $0x20] sm:$0xff]  ;;  %v251_v13 = vld [vmem:[%s1093_s21 + $0x48] sm:$0xff]  ;;  %v244_v14 = vld [vmem:[%s1093_s21 + $0x10] sm:$0xff]  ;;  %s593_s4 = sshll.u32 %s1143_s9, 4  ;;  %s1199_s15 = scalar_lea.hbm %s1272_s3, %s731_s16  ;;  %s1207_s4 = int_to_ptr.vmem [resolvable:$true] %s593_s4 }
  0x21   : > { %v803_v10 = vpack.c.bf16 %v263_v9, %v262_v8  ;;  %v252_v15 = vld [vmem:[%s1093_s21 + $0x50] sm:$0xff]  ;;  %v245_v16 = vld [vmem:[%s1093_s21 + $0x18] sm:$0xff]  ;;  %v246_v18 = vld [vmem:[%s1093_s21 + $0x20] sm:$0xff]  ;;  %s1217_s27 = scalar_lea.sflag [#allocation3], %s217_s5  ;;  %s987_s29 = smov [#allocation2]  }
  0x22   : > { %796 = vmatprep.subr.bf16.mxu0 %v795_v5  ;;  %807 = vmatprep.subr.bf16.mxu1 %v795_v5  ;;  %v253_v17 = vld [vmem:[%s1093_s21 + $0x58] sm:$0xff]  ;;  %v254_v19 = vld [vmem:[%s1093_s21 + $0x60] sm:$0xff]  ;;  %v247_v20 = vld [vmem:[%s1093_s21 + $0x28] sm:$0xff]  ;;  %s894_s6 = sshll.u32 %s987_s29, 4  ;;  %s895_s6 = int_to_ptr.vmem [resolvable:$false] %s894_s6 }
  0x23   : > { %798 = vmatpush3.bf16.msra.mxu0 %v795_v5  ;;  %811 = vmatpush3.bf16.msra.mxu1 %v795_v5  ;;  %v255_v21 = vld [vmem:[%s1093_s21 + $0x68] sm:$0xff]  ;;  %v248_v22 = vld [vmem:[%s1093_s21 + $0x30] sm:$0xff]  ;;  %v249_v24 = vld [vmem:[%s1093_s21 + $0x38] sm:$0xff]  ;;  %s896_s7 = scalar_lea.vmem %s895_s6, 4096  ;;  %p897_p4 = scmp.lt.s32.totalorder %s1207_s4, %s895_s6 }
  0x24   : > { %800 = vmatprep.subr.bf16.mxu0 %v799_v7  ;;  %808 = vmatprep.subr.bf16.mxu1 %v799_v7  ;;  %v256_v23 = vld [vmem:[%s1093_s21 + $0x70] sm:$0xff]  ;;  %v257_v25 = vld [vmem:[%s1093_s21 + $0x78] sm:$0xff]  ;;  %v472_v42 = vld [vmem:[%s1135_s8 + $0x48] sm:$0xff] }
  0x25   : > { %v464_v43 = vld [vmem:[%s1135_s8 + $0x8] sm:$0xff]  ;;  %v463_v48 = vld [vmem:[%s1135_s8] sm:$0xff]  ;;  %v466_v49 = vld [vmem:[%s1135_s8 + $0x18] sm:$0xff] }
  0x26   : > { %v471_v54 = vld [vmem:[%s1135_s8 + $0x40] sm:$0xff]  ;;  %v474_v55 = vld [vmem:[%s1135_s8 + $0x58] sm:$0xff]  ;;  %v473_v60 = vld [vmem:[%s1135_s8 + $0x50] sm:$0xff] }
  0x27   : > { %802 = vmatpush3.bf16.msra.mxu0 %v799_v7  ;;  %812 = vmatpush3.bf16.msra.mxu1 %v799_v7  ;;  %v465_v61 = vld [vmem:[%s1135_s8 + $0x10] sm:$0xff]  ;;  %v468_v2 = vld [vmem:[%s1135_s8 + $0x28] sm:$0xff]  ;;  %v467_v3 = vld [vmem:[%s1135_s8 + $0x20] sm:$0xff] }
  0x28   : > { %804 = vmatprep.subr.bf16.mxu0 %v803_v10  ;;  %809 = vmatprep.subr.bf16.mxu1 %v803_v10  ;;  %v476_v8 = vld [vmem:[%s1135_s8 + $0x68] sm:$0xff]  ;;  %v475_v9 = vld [vmem:[%s1135_s8 + $0x60] sm:$0xff] }
  0x2b   : > { %806 = vmatpush3.bf16.msra.mxu0 %v803_v10  ;;  %813 = vmatpush3.bf16.msra.mxu1 %v803_v10 }
  0x2c   : > { %769 = vmatprep.subr.msk.mxu0 %vm314_vm1, %v264_v11  ;;  %810 = vmatprep.subr.msk.mxu1 %vm314_vm1, %v264_v11 }
  0x2f   : > { %770 = vmatpush3.msk.msra.mxu0 %vm314_vm1, %v264_v11  ;;  %814 = vmatpush3.msk.msra.mxu1 %vm314_vm1, %v264_v11 }
  0x30   : > { %772 = vmatmul.mubr.msk.f32.vlgmr.msra.gmra.mrb[0].mxu0 %vm265_vm0, %v243_v12  ;;  %784 = vmatmul.mubr.msk.f32.vlgmr.msra.gmra.mrb[0].mxu1 %vm265_vm0, %v251_v13 }
  0x31   : > { %774 = vmatprep.mubr.msk.f32.mxu0 %vm265_vm0, %v244_v14  ;;  %786 = vmatprep.mubr.msk.f32.mxu1 %vm265_vm0, %v252_v15  ;;  %v470_v14 = vld [vmem:[%s1135_s8 + $0x38] sm:$0xff]  ;;  %v469_v15 = vld [vmem:[%s1135_s8 + $0x30] sm:$0xff] }
  0x34   : > { %775 = vmatmul.mubr.msk.f32.gmra.mrb[2].mxu0 %vm265_vm0, %v245_v16  ;;  %787 = vmatmul.mubr.msk.f32.gmra.mrb[2].mxu1 %vm265_vm0, %v253_v17 }
  0x35   : > { %777 = vmatprep.mubr.msk.f32.mxu0 %vm265_vm0, %v246_v18  ;;  %789 = vmatprep.mubr.msk.f32.mxu1 %vm265_vm0, %v254_v19 }
  0x38   : > { %778 = vmatmul.mubr.msk.f32.gmra.mrb[4].mxu0 %vm265_vm0, %v247_v20  ;;  %790 = vmatmul.mubr.msk.f32.gmra.mrb[4].mxu1 %vm265_vm0, %v255_v21  ;;  %v478_v20 = vld [vmem:[%s1135_s8 + $0x78] sm:$0xff]  ;;  %v477_v21 = vld [vmem:[%s1135_s8 + $0x70] sm:$0xff] }
  0x39   : > { %780 = vmatprep.mubr.msk.f32.mxu0 %vm265_vm0, %v248_v22  ;;  %792 = vmatprep.mubr.msk.f32.mxu1 %vm265_vm0, %v256_v23 }
  0x3c   : > { %781 = vmatmul.mubr.msk.f32.gmra.mrb[6].mxu0 %vm265_vm0, %v249_v24  ;;  %793 = vmatmul.mubr.msk.f32.gmra.mrb[6].mxu1 %vm265_vm0, %v257_v25 }
 0x103   : > { %v773_v26 = vpop.f32.mrb[0].mxu0  ;;  %v785_v27 = vpop.f32.mrb[0].mxu1 }
 0x104   : > { %513 = vrot.lane.b32.xlu1 %v785_v27, %s986_s28  ;;  %v424_v28 = vpop.f32.mrb[1].mxu1  ;;  %497 = vrot.lane.b32.xlu0 %v773_v26, %s986_s28  ;;  %v384_v29 = vpop.f32.mrb[1].mxu0 }
 0x107   : > { %v776_v30 = vpop.f32.mrb[2].mxu0  ;;  %v788_v31 = vpop.f32.mrb[2].mxu1 }
 0x108   : > { %495 = vrot.lane.b32.xlu0 %v384_v29, %s986_s28  ;;  %501 = vrot.lane.b32.xlu1 %v776_v30, %s986_s28  ;;  %v394_v32 = vpop.f32.mrb[3].mxu0  ;;  %v434_v33 = vpop.f32.mrb[3].mxu1 }
 0x10b   : > { %v779_v34 = vpop.f32.mrb[4].mxu0  ;;  %v791_v35 = vpop.f32.mrb[4].mxu1 }
 0x10c   : > { %511 = vrot.lane.b32.xlu0 %v424_v28, %s986_s28  ;;  %517 = vrot.lane.b32.xlu1 %v788_v31, %s986_s28  ;;  %v404_v36 = vpop.f32.mrb[5].mxu0  ;;  %v444_v37 = vpop.f32.mrb[5].mxu1 }
 0x10f   : > { %v782_v38 = vpop.f32.mrb[6].mxu0  ;;  %v794_v39 = vpop.f32.mrb[6].mxu1 }
 0x110   : > { %515 = vrot.lane.b32.xlu0 %v434_v33, %s986_s28  ;;  %499 = vrot.lane.b32.xlu1 %v394_v32, %s986_s28  ;;  %v414_v40 = vpop.f32.mrb[7].mxu0  ;;  %v454_v41 = vpop.f32.mrb[7].mxu1 }
 0x114   : > { %505 = vrot.lane.b32.xlu1 %v779_v34, %s986_s28  ;;  %503 = vrot.lane.b32.xlu0 %v404_v36, %s986_s28 }
 0x118   : > { %521 = vrot.lane.b32.xlu1 %v791_v35, %s986_s28  ;;  %519 = vrot.lane.b32.xlu0 %v444_v37, %s986_s28 }
 0x11c   : > { %509 = vrot.lane.b32.xlu1 %v782_v38, %s986_s28  ;;  %507 = vrot.lane.b32.xlu0 %v414_v40, %s986_s28 }
 0x120   : > { %525 = vrot.lane.b32.xlu1 %v794_v39, %s986_s28  ;;  %523 = vrot.lane.b32.xlu0 %v454_v41, %s986_s28  ;;  %s890_s28 = scalar_lea.vmem %s1207_s4, 2048 }
 0x121   : > { %p891_p0 = scmp.ne.s32.totalorder %s1207_s4, %s890_s28  ;;  %p898_p5 = scmp.lt.s32.totalorder %s896_s7, %s890_s28 }
 0x123   : > { %p892_p1 = pnand %p891_p0, %p1061_p3  ;;  %p899_p6 = por %p898_p5, %p897_p4 }
 0x125   : > { %p893_p2 = pneg %p892_p1 }
 0x127   : > { %p900_p7 = pnand %p899_p6, %p893_p2 }
 0x176   : > { %v514_v44 = vpop.permute.xlu1 %513  ;;  %v498_v45 = vpop.permute.xlu0 %497 }
 0x177   : > { %v553_v46 = vsel %vm543_vm2, %v472_v42, %v514_v44  ;;  %v545_v47 = vsel %vm543_vm2, %v464_v43, %v498_v45 }
 0x178   : > { %570 = vst.msk [vmem:[%s1143_s9 + $0x48] sm:$0xff] %vm560_vm3, %v553_v46  ;;  %562 = vst.msk [vmem:[%s1143_s9 + $0x8] sm:$0xff] %vm560_vm3, %v545_v47 }
 0x17a   : > { %v496_v50 = vpop.permute.xlu0 %495  ;;  %v502_v51 = vpop.permute.xlu1 %501 }
 0x17b   : > { %v544_v52 = vsel %vm543_vm2, %v463_v48, %v496_v50  ;;  %v547_v53 = vsel %vm543_vm2, %v466_v49, %v502_v51 }
 0x17c   : > { %561 = vst.msk [vmem:[%s1143_s9] sm:$0xff] %vm560_vm3, %v544_v52  ;;  %564 = vst.msk [vmem:[%s1143_s9 + $0x18] sm:$0xff] %vm560_vm3, %v547_v53 }
 0x17e   : > { %v512_v56 = vpop.permute.xlu0 %511  ;;  %v518_v57 = vpop.permute.xlu1 %517 }
 0x17f   : > { %v552_v58 = vsel %vm543_vm2, %v471_v54, %v512_v56  ;;  %v555_v59 = vsel %vm543_vm2, %v474_v55, %v518_v57 }
 0x180   : > { %569 = vst.msk [vmem:[%s1143_s9 + $0x40] sm:$0xff] %vm560_vm3, %v552_v58  ;;  %572 = vst.msk [vmem:[%s1143_s9 + $0x58] sm:$0xff] %vm560_vm3, %v555_v59 }
 0x182   : > { %v516_v62 = vpop.permute.xlu0 %515  ;;  %v500_v63 = vpop.permute.xlu1 %499 }
 0x183   : > { %v554_v0 = vsel %vm543_vm2, %v473_v60, %v516_v62  ;;  %v546_v1 = vsel %vm543_vm2, %v465_v61, %v500_v63 }
 0x184   : > { %571 = vst.msk [vmem:[%s1143_s9 + $0x50] sm:$0xff] %vm560_vm3, %v554_v0  ;;  %563 = vst.msk [vmem:[%s1143_s9 + $0x10] sm:$0xff] %vm560_vm3, %v546_v1 }
 0x186   : > { %v506_v4 = vpop.permute.xlu1 %505  ;;  %v504_v5 = vpop.permute.xlu0 %503 }
 0x187   : > { %v549_v6 = vsel %vm543_vm2, %v468_v2, %v506_v4  ;;  %v548_v7 = vsel %vm543_vm2, %v467_v3, %v504_v5 }
 0x188   : > { %566 = vst.msk [vmem:[%s1143_s9 + $0x28] sm:$0xff] %vm560_vm3, %v549_v6  ;;  %565 = vst.msk [vmem:[%s1143_s9 + $0x20] sm:$0xff] %vm560_vm3, %v548_v7 }
 0x18a   : > { %v522_v10 = vpop.permute.xlu1 %521  ;;  %v520_v11 = vpop.permute.xlu0 %519 }
 0x18b   : > { %v557_v12 = vsel %vm543_vm2, %v476_v8, %v522_v10  ;;  %v556_v13 = vsel %vm543_vm2, %v475_v9, %v520_v11 }
 0x18c   : > { %574 = vst.msk [vmem:[%s1143_s9 + $0x68] sm:$0xff] %vm560_vm3, %v557_v12  ;;  %573 = vst.msk [vmem:[%s1143_s9 + $0x60] sm:$0xff] %vm560_vm3, %v556_v13 }
 0x18e   : > { %v510_v16 = vpop.permute.xlu1 %509  ;;  %v508_v17 = vpop.permute.xlu0 %507 }
 0x18f   : > { %v551_v18 = vsel %vm543_vm2, %v470_v14, %v510_v16  ;;  %v550_v19 = vsel %vm543_vm2, %v469_v15, %v508_v17 }
 0x190   : > { %568 = vst.msk [vmem:[%s1143_s9 + $0x38] sm:$0xff] %vm560_vm3, %v551_v18  ;;  %567 = vst.msk [vmem:[%s1143_s9 + $0x30] sm:$0xff] %vm560_vm3, %v550_v19 }
 0x192   : > { %v526_v22 = vpop.permute.xlu1 %525  ;;  %v524_v23 = vpop.permute.xlu0 %523 }
 0x193   : > { %v559_v24 = vsel %vm543_vm2, %v478_v20, %v526_v22  ;;  %v558_v25 = vsel %vm543_vm2, %v477_v21, %v524_v23 }
 0x194   : > { %576 = vst.msk [vmem:[%s1143_s9 + $0x78] sm:$0xff] %vm560_vm3, %v559_v24  ;;  %575 = vst.msk [vmem:[%s1143_s9 + $0x70] sm:$0xff] %vm560_vm3, %v558_v25 }
 0x195   : > { %903 = shalt.err (!%p900_p7)
}
 0x196   : > { %s904_s5 = scalar_lea.hbm %s1199_s15, 2048  ;;  %s908_s9 = scalar_lea.hbm %s1272_s3, 8192 }
 0x197   : > { %p905_p9 = scmp.ne.s32.totalorder %s1199_s15, %s904_s5  ;;  %p909_p12 = scmp.lt.u32.totalorder %s1199_s15, %s1272_s3 }
 0x198   : > { %p910_p13 = scmp.lt.u32.totalorder %s908_s9, %s904_s5  ;;  %p912_p1 = scmp.lt.u32.totalorder %s904_s5, %s1199_s15 }
 0x199   : > { %p906_p10 = pnand %p905_p9, %p1061_p3 }
 0x19a   : > { %p911_p0 = por %p910_p13, %p909_p12 }
 0x19b   : > { %p907_p11 = pneg %p906_p10 }
 0x19c   : > { %p913_p2 = por %p912_p1, %p911_p0 }
 0x19e   : > { %p914_p4 = pnand %p913_p2, %p907_p11 }
 0x1a0   : > { %917 = shalt.err (!%p914_p4)
}
 0x1a1   : > { %s988_s16 = smov 128   ;;  %s989_s21 = smov 8  }
 0x1a2   : > { %816 = dma.vmem_to_hbm [thread:$0]  (%p1061_p3), %s1207_s4, 2048, %s1199_s15, %s1217_s27, %s988_s16, %s988_s16, %s989_s21  }
 0x1a3 PF: > { %p822_p5 = scmp.ge.s32.totalorder %s984_s19, 2  ;;  %s608_s24 = sand.u32 1, %s956_s12  }
 0x1a4   : > { %s609_s28 = scalar_lea.sflag [#allocation3], %s608_s24 }
 0x1a5   : > { %p819_p6 = pnand %p822_p5, %p1070_p8 }
 0x1a7   : > { %951 = dma.done.wait (!%p819_p6), %s609_s28, 2048  }
 0x1a8   : > { %953 = vsyncadd (!%p819_p6), %s609_s28, 4294965248  ;;  %s16_s19 = sadd.s32 1, %s984_s19   ;;  %s1275_s12 = smov %s960_s13 }
 0x1a9   : > { %p13_p7 = scmp.ge.s32.totalorder %s16_s19, 6   ;;  %s1276_s13 = smov %s964_s14 }
 0x1aa   : > { %s1277_s14 = smov %s1079_s30  ;;  %s1278_s15 = smov %s976_s17 }
 0x1ab   : > { %s1279_s16 = smov %s980_s18  ;;  %s1280_s17 = smov %s1283_s22 }
 0x1ac   : > { %s1281_s18 = smov %s1287_s23  ;;  %15 = sbr.rel (!%p13_p7) target bundleno = 5 (0x5), region = 73 }
 0x1b3   :  { %614 = vsyncpa [#allocation3], 1 }
 0x1b4   :  { %616 = vsyncpa [#allocation3 + $0x1], 1 }

// kernel: pyramid_pooling_forward.2
= control target key start
LH: loop header
LB: loop body
LE: loop exit
PB: predicated region body
PF: predicated region fallthrough
CT: control target
= control target key end

     0   :  { %s1139_s21 = smov 0   ;;  %s1141_s22 = smov 0   ;;  %s1342_s0 = inlined_call_operand.vmem [shape: f32[2,256,16], index: 0, kind: input, shape index: {}]   ;;  %s1343_s1 = inlined_call_operand.vmem [shape: f32[50,256], index: 1, kind: input, shape index: {}]   ;;  %s1344_s2 = inlined_call_operand.vmem [shape: f32[16,16], index: 2, kind: input, shape index: {}]   ;;  %s1345_s3 = inlined_call_operand.vmem [shape: f32[1,16], index: 3, kind: input, shape index: {}]   ;;  %s1346_s4 = inlined_call_operand.vmem [shape: f32[1,16], index: 4, kind: input, shape index: {}]   ;;  %s1347_s5 = inlined_call_operand.vmem [shape: f32[50,16], index: 5, kind: input, shape index: {}]   ;;  %s1348_s6 = inlined_call_operand.vmem [shape: f32[2,50,16], index: 6, kind: output, shape index: {}]  }
   0x1   :  { %s1143_s23 = smov 0   ;;  %s1145_s24 = smov 0  }
   0x2   :  { %s1147_s25 = smov 0   ;;  %s1149_s26 = smov 0  }
   0x3   :  { %s1151_s27 = smov 0  }
   0x4 LB: > { %s25_s28 = sadd.s32 1, %s1087_s25  ;;  %s28_s29 = sadd.s32 1, %s1091_s26  ;;  %s1095_s27 = sphi %s1151_s27, %s16_s27   ;;  %s1091_s26 = sphi %s1149_s26, %s1354_s26   ;;  %s1087_s25 = sphi %s1147_s25, %s1353_s25   ;;  %s1083_s24 = sphi %s1145_s24, %s1352_s24   ;;  %s1079_s23 = sphi %s1143_s23, %s1351_s23   ;;  %s1075_s22 = sphi %s1141_s22, %s1350_s22   ;;  %s1071_s21 = sphi %s1139_s21, %s1349_s21  }
   0x5   : > { %p26_p0 = scmp.ge.s32.totalorder %s25_s28, 2  ;;  %s63_s30 = sadd.s32 1, %s1075_s22 }
   0x6   : > { %p70_p1 = scmp.ne.s32.totalorder %s1075_s22, %s1071_s21  ;;  %p71_p2 = scmp.eq.s32.totalorder %s1095_s27, 0 }
   0x7   : > { %s1356_s28 = smov (%p26_p0, %s25_s28), 0  ;;  %s1358_s29 = smov (!%p26_p0, %s28_s29), %s1091_s26 }
   0x8   : > { %s60_s7 = ssub.s32 %s1087_s25, %s1356_s28  ;;  %p72_p3 = por %p71_p2, %p70_p1 }
   0x9   : > { %p30_p4 = scmp.ge.s32.totalorder %s1358_s29, 2  ;;  %p61_p5 = scmp.eq.s32.totalorder %s60_s7, 0 }
   0xa   : > { %p800_p6 = scmp.ge.s32.totalorder %s1095_s27, 4 }
   0xb   : > { %s1360_s29 = smov (%p30_p4, %s1358_s29), 0 }
   0xc   : > { %s1188_s8 = scalar_select %p61_p5, %s1075_s22, %s63_s30  }
   0xd   : > { %218 = sbr.rel (%p800_p6) target bundleno = 28 (0x1c), region = 32 }
  0x14   : > { %234 = sbr.rel (!%p72_p3) target bundleno = 28 (0x1c), region = 40  ;;  %s236_s9 = sand.u32 (%p72_p3), 1, %s1075_s22  }
  0x15   : > { %s801_s10 = sshll.u32 (%p72_p3), %s1087_s25, 3  ;;  %s975_s11 = smul.u32 (%p72_p3), 56, %s236_s9 }
  0x16   : > { %s240_s14 = scalar_lea.vmem (%p72_p3), %s1343_s1, %s801_s10 }
  0x17   : > { %v280_v0 = vld [vmem:[%s240_s14] sm:$0xff] (%p72_p3)  ;;  %v282_v1 = vld [vmem:[%s240_s14 + $0x10] sm:$0xff] (%p72_p3)  ;;  %s238_s15 = scalar_lea.vmem (%p72_p3), [#allocation3], %s975_s11 }
  0x18   : > { %v284_v2 = vld [vmem:[%s240_s14 + $0x20] sm:$0xff] (%p72_p3)  ;;  %v286_v3 = vld [vmem:[%s240_s14 + $0x30] sm:$0xff] (%p72_p3)  ;;  %281 = vst [vmem:[%s238_s15] sm:$0xff] (%p72_p3), %v280_v0  ;;  %283 = vst [vmem:[%s238_s15 + $0x8] sm:$0xff] (%p72_p3), %v282_v1 }
  0x19   : > { %v288_v4 = vld [vmem:[%s240_s14 + $0x40] sm:$0xff] (%p72_p3)  ;;  %v290_v5 = vld [vmem:[%s240_s14 + $0x50] sm:$0xff] (%p72_p3)  ;;  %285 = vst [vmem:[%s238_s15 + $0x10] sm:$0xff] (%p72_p3), %v284_v2  ;;  %287 = vst [vmem:[%s238_s15 + $0x18] sm:$0xff] (%p72_p3), %v286_v3 }
  0x1a   : > { %289 = vst [vmem:[%s238_s15 + $0x20] sm:$0xff] (%p72_p3), %v288_v4  ;;  %291 = vst [vmem:[%s238_s15 + $0x28] sm:$0xff] (%p72_p3), %v290_v5  ;;  %v292_v6 = vld [vmem:[%s240_s14 + $0x60] sm:$0xff] (%p72_p3) }
  0x1b   : > { %293 = vst [vmem:[%s238_s15 + $0x30] sm:$0xff] %v292_v6 }
  0x1c PF: > { %p802_p7 = scmp.ge.s32.totalorder %s1095_s27, 1  ;;  %p298_p8 = scmp.lt.s32.totalorder %s1095_s27, 5 }
  0x1e   : > { %p299_p9 = pnand %p802_p7, %p298_p8 }
  0x1f   : > { %s305_s16 = sand.u32 (!%p299_p9), 1, %s1071_s21   ;;  %s803_s17 = sshll.u32 (!%p299_p9), %s1079_s23, 4 }
  0x20   : > { %302 = sbr.rel (%p299_p9) target bundleno = 537 (0x219), region = 78  ;;  %p344_p10 = scmp.lt.s32.totalorder (!%p299_p9), %s1083_s24, 1 }
  0x21   : > { %s976_s18 = smul.u32 (!%p299_p9), 56, %s305_s16  ;;  %p346_p11 = scmp.lt.s32.totalorder (!%p299_p9), %s803_s17, 31 }
  0x22   : > { %p807_p12 = scmp.ne.s32.totalorder (!%p299_p9), %s1079_s23, 0 }
  0x23   : > { %s1212_s21 = scalar_lea.vmem (!%p299_p9), [#allocation3], %s976_s18 }
  0x27   : > { %s1362_s24 = smov (!%p344_p10, %s1083_s24), 1  ;;  %s1364_s17 = smov (!%p346_p11, %s803_s17), 31 }
  0x28   : > { %s804_s19 = sshll.u32 %s1362_s24, 5  ;;  %s977_s20 = smul.u32 56, %s1362_s24  ;;  %vm362_vm0 = vcmask (!%p807_p12), 130048   ;;  %vm369_vm1 = vcmask (!%p807_p12), 123904   ;;  %v1097_v7 = vmov (!%p807_p12), 0.0  }
  0x29   : > { %s349_s30 = sadd.s32 %s804_s19, %s1364_s17  ;;  %361 = sbr.rel (%p807_p12) target bundleno = 48 (0x30), region = 86  ;;  %363 = vst.msk [vmem:[#allocation2] sm:$0xff] (!%p807_p12), %vm362_vm0, %v1097_v7  ;;  %364 = vst.msk [vmem:[#allocation2 + $0x8] sm:$0xff] (!%p807_p12), %vm362_vm0, %v1097_v7 }
  0x2a   : > { %s805_s7 = sshll.u32 %s349_s30, 3  ;;  %s1205_s11 = scalar_lea.vmem %s1348_s6, %s977_s20  ;;  %365 = vst.msk [vmem:[#allocation2 + $0x10] sm:$0xff] (!%p807_p12), %vm362_vm0, %v1097_v7  ;;  %366 = vst.msk [vmem:[#allocation2 + $0x18] sm:$0xff] (!%p807_p12), %vm362_vm0, %v1097_v7 }
  0x2b   : > { %s1210_s14 = scalar_lea.vmem %s1342_s0, %s805_s7  ;;  %367 = vst.msk [vmem:[#allocation2 + $0x20] sm:$0xff] (!%p807_p12), %vm362_vm0, %v1097_v7  ;;  %368 = vst.msk [vmem:[#allocation2 + $0x28] sm:$0xff] (!%p807_p12), %vm362_vm0, %v1097_v7 }
  0x2c   : > { %370 = vst.msk [vmem:[#allocation2 + $0x30] sm:$0x3] (!%p807_p12), %vm369_vm1, %v1097_v7 }
  0x30 PF: > { %v385_v8 = vld [vmem:[%s1210_s14] sm:$0xff]  ;;  %v386_v9 = vld [vmem:[%s1210_s14 + $0x8] sm:$0xff]  ;;  %v387_v10 = vld [vmem:[%s1210_s14 + $0x10] sm:$0xff]  ;;  %v1098_v11 = vmov 0.0|0.0   ;;  %vm1099_vm2 = vmmov 0   ;;  %v1100_v14 = vmov 0.0  }
  0x31   : > { %930 = vmatprep.subr.bf16.mxu0 %v1098_v11  ;;  %v931_v12 = vpack.c.bf16 %v386_v9, %v385_v8  ;;  %957 = vmatprep.subr.bf16.mxu1 %v1098_v11  ;;  %v388_v13 = vld [vmem:[%s1210_s14 + $0x18] sm:$0xff]  ;;  %v389_v16 = vld [vmem:[%s1210_s14 + $0x20] sm:$0xff]  ;;  %v390_v17 = vld [vmem:[%s1210_s14 + $0x28] sm:$0xff]  ;;  %vm508_vm3 = vcmask 130048   ;;  %vm515_vm4 = vcmask 123904   ;;  %p808_p13 = scmp.ne.s32.totalorder %s1079_s23, 1 }
  0x32   : > { %884 = vmatprep.mubr.msk.f32.mxu0 %vm1099_vm2, %v1100_v14  ;;  %896 = vmatprep.mubr.msk.f32.mxu1 %vm1099_vm2, %v1100_v14  ;;  %v934_v15 = vpack.c.bf16 %v388_v13, %v387_v10  ;;  %v937_v18 = vpack.c.bf16 %v390_v17, %v389_v16  ;;  %v391_v19 = vld [vmem:[%s1210_s14 + $0x30] sm:$0xff]  ;;  %v392_v20 = vld [vmem:[%s1210_s14 + $0x38] sm:$0xff]  ;;  %v393_v22 = vld [vmem:[%s1210_s14 + $0x40] sm:$0xff]  ;;  %v1101_v7 = vmov (!%p808_p13), 0.0|0.0   ;;  %vm1102_vm5 = vmmov (!%p808_p13), 0  }
  0x33   : > { %932 = vmatpush3.bf16.msra.mxu0 %v931_v12  ;;  %965 = vmatpush3.bf16.msra.mxu1 %v931_v12  ;;  %v940_v21 = vpack.c.bf16 %v392_v20, %v391_v19  ;;  %v394_v23 = vld [vmem:[%s1210_s14 + $0x48] sm:$0xff]  ;;  %v395_v25 = vld [vmem:[%s1210_s14 + $0x50] sm:$0xff]  ;;  %v396_v26 = vld [vmem:[%s1210_s14 + $0x58] sm:$0xff]  ;;  %v1103_v9 = vmov (!%p808_p13), 0.0  }
  0x34   : > { %933 = vmatprep.subr.bf16.mxu0 %v1098_v11  ;;  %958 = vmatprep.subr.bf16.mxu1 %v1098_v11  ;;  %v943_v24 = vpack.c.bf16 %v394_v23, %v393_v22  ;;  %v946_v27 = vpack.c.bf16 %v396_v26, %v395_v25  ;;  %v397_v28 = vld [vmem:[%s1210_s14 + $0x60] sm:$0xff]  ;;  %v398_v29 = vld [vmem:[%s1210_s14 + $0x68] sm:$0xff]  ;;  %v399_v31 = vld [vmem:[%s1210_s14 + $0x70] sm:$0xff] }
  0x35   : > { %v949_v30 = vpack.c.bf16 %v398_v29, %v397_v28  ;;  %v400_v32 = vld [vmem:[%s1210_s14 + $0x78] sm:$0xff]  ;;  %v380_v38 = vld [vmem:[%s1212_s21 + $0x10] sm:$0xff]  ;;  %v381_v40 = vld [vmem:[%s1212_s21 + $0x18] sm:$0xff] }
  0x36   : > { %v952_v33 = vpack.c.bf16 %v400_v32, %v399_v31  ;;  %v378_v34 = vld [vmem:[%s1212_s21] sm:$0xff]  ;;  %v379_v36 = vld [vmem:[%s1212_s21 + $0x8] sm:$0xff]  ;;  %v384_v39 = vld [vmem:[%s1212_s21 + $0x30] sm:$0x3] }
  0x37   : > { %935 = vmatpush3.bf16.msra.mxu0 %v934_v15  ;;  %966 = vmatpush3.bf16.msra.mxu1 %v934_v15  ;;  %v382_v35 = vld [vmem:[%s1212_s21 + $0x20] sm:$0xff]  ;;  %v383_v37 = vld [vmem:[%s1212_s21 + $0x28] sm:$0xff]  ;;  %v372_v49 = vld [vmem:[#allocation2 + $0x8] sm:$0xff] }
  0x38   : > { %936 = vmatprep.subr.bf16.mxu0 %v1098_v11  ;;  %959 = vmatprep.subr.bf16.mxu1 %v1098_v11  ;;  %v371_v41 = vld [vmem:[#allocation2] sm:$0xff]  ;;  %v376_v50 = vld [vmem:[#allocation2 + $0x28] sm:$0xff]  ;;  %v373_v57 = vld [vmem:[#allocation2 + $0x10] sm:$0xff] }
  0x39   : > { %v375_v42 = vld [vmem:[#allocation2 + $0x20] sm:$0xff]  ;;  %v377_v58 = vld [vmem:[#allocation2 + $0x30] sm:$0x3]  ;;  %v374_v1 = vld [vmem:[#allocation2 + $0x18] sm:$0xff] }
  0x3a   : > { %v528_v5 = vld [vmem:[%s1344_s2] sm:$0xff] (!%p808_p13)  ;;  %v529_v6 = vld [vmem:[%s1344_s2 + $0x8] sm:$0xff] (!%p808_p13) }
  0x3b   : > { %938 = vmatpush3.bf16.msra.mxu0 %v937_v18  ;;  %967 = vmatpush3.bf16.msra.mxu1 %v937_v18  ;;  %v955_v8 = vpack.c.bf16 (!%p808_p13), %v529_v6, %v528_v5  ;;  %v816_v17 = vld [vmem:[%s1345_s3] ss:$0 sm:$0xff] (!%p808_p13) }
  0x3c   : > { %939 = vmatprep.subr.bf16.mxu0 %v1098_v11  ;;  %960 = vmatprep.subr.bf16.mxu1 %v1098_v11  ;;  %v817_v19 = vld [vmem:[%s1346_s4] ss:$0 sm:$0xff] (!%p808_p13) }
  0x3d   : > { %v690_v28 = vld [vmem:[%s1347_s5 + $0x20] sm:$0xff] (!%p808_p13) }
  0x3f   : > { %941 = vmatpush3.bf16.msra.mxu0 %v940_v21  ;;  %968 = vmatpush3.bf16.msra.mxu1 %v940_v21 }
  0x40   : > { %942 = vmatprep.subr.bf16.mxu0 %v1098_v11  ;;  %961 = vmatprep.subr.bf16.mxu1 %v1098_v11 }
  0x43   : > { %944 = vmatpush3.bf16.msra.mxu0 %v943_v24  ;;  %969 = vmatpush3.bf16.msra.mxu1 %v943_v24 }
  0x44   : > { %945 = vmatprep.subr.bf16.mxu0 %v1098_v11  ;;  %962 = vmatprep.subr.bf16.mxu1 %v1098_v11 }
  0x47   : > { %947 = vmatpush3.bf16.msra.mxu0 %v946_v27  ;;  %970 = vmatpush3.bf16.msra.mxu1 %v946_v27  ;;  %v686_v27 = vld [vmem:[%s1347_s5] sm:$0xff] (!%p808_p13) }
  0x48   : > { %948 = vmatprep.subr.bf16.mxu0 %v1098_v11  ;;  %963 = vmatprep.subr.bf16.mxu1 %v1098_v11 }
  0x4b   : > { %950 = vmatpush3.bf16.msra.mxu0 %v949_v30  ;;  %971 = vmatpush3.bf16.msra.mxu1 %v949_v30 }
  0x4c   : > { %951 = vmatprep.subr.bf16.mxu0 %v1098_v11  ;;  %964 = vmatprep.subr.bf16.mxu1 %v1098_v11 }
  0x4f   : > { %953 = vmatpush3.bf16.msra.mxu0 %v952_v33  ;;  %972 = vmatpush3.bf16.msra.mxu1 %v952_v33 }
  0x50   : > { %954 = vmatprep.subr.bf16.mxu0 (!%p808_p13), %v1101_v7  ;;  %973 = vmatprep.subr.bf16.mxu1 (!%p808_p13), %v1101_v7 }
  0x52   : > { %885 = vmatmul.mubr.f32.vlgmr.msra.gmra.mrb[0].mxu0 %v378_v34  ;;  %897 = vmatmul.mubr.f32.vlgmr.msra.gmra.mrb[0].mxu1 %v382_v35 }
  0x53   : > { %887 = vmatprep.mubr.msk.f32.mxu0 %vm1099_vm2, %v1100_v14  ;;  %899 = vmatprep.mubr.msk.f32.mxu1 %vm1099_vm2, %v1100_v14 }
  0x54   : > { %956 = vmatpush3.bf16.msra.mxu0 (!%p808_p13), %v955_v8  ;;  %974 = vmatpush3.bf16.msra.mxu1 (!%p808_p13), %v955_v8 }
  0x56   : > { %888 = vmatmul.mubr.f32.gmra.mrb[2].mxu0 %v379_v36  ;;  %900 = vmatmul.mubr.f32.gmra.mrb[2].mxu1 %v383_v37 }
  0x57   : > { %890 = vmatprep.mubr.msk.f32.mxu0 %vm1099_vm2, %v1100_v14  ;;  %902 = vmatprep.mubr.msk.f32.mxu1 %vm1099_vm2, %v1100_v14 }
  0x5a   : > { %891 = vmatmul.mubr.f32.gmra.mrb[4].mxu0 %v380_v38  ;;  %903 = vmatmul.mubr.f32.gmra.mrb[4].mxu1 %v384_v39 }
  0x5b   : > { %893 = vmatprep.mubr.msk.f32.mxu0 %vm1099_vm2, %v1100_v14  ;;  %921 = vmatprep.mubr.msk.f32.mxu1 (!%p808_p13), %vm1102_vm5, %v1103_v9 }
  0x5e   : > { %894 = vmatmul.mubr.f32.gmra.mrb[6].mxu0 %v381_v40 }
  0x5f   : > { %909 = vmatprep.mubr.msk.f32.mxu0 (!%p808_p13), %vm1102_vm5, %v1103_v9 }
 0x125   : > { %v467_v43 = vpop.f32.mrb[0].mxu0  ;;  %v487_v44 = vpop.f32.mrb[0].mxu1 }
 0x126   : > { %v501_v45 = vadd.f32 %v467_v43, %v371_v41  ;;  %v886_v46 = vpop.f32.mrb[1].mxu0  ;;  %v505_v47 = vadd.f32 %v487_v44, %v375_v42  ;;  %v898_v48 = vpop.f32.mrb[1].mxu1  ;;  %v687_v41 = vld [vmem:[%s1347_s5 + $0x8] sm:$0xff] (!%p808_p13) }
 0x127   : > { %v691_v42 = vld [vmem:[%s1347_s5 + $0x28] sm:$0xff] (!%p808_p13) }
 0x128   : > { %509 = vst.msk [vmem:[#allocation2] sm:$0xff] %vm508_vm3, %v501_v45  ;;  %513 = vst.msk [vmem:[#allocation2 + $0x20] sm:$0xff] %vm508_vm3, %v505_v47 }
 0x129   : > { %v472_v51 = vpop.f32.mrb[2].mxu0  ;;  %v492_v52 = vpop.f32.mrb[2].mxu1 }
 0x12a   : > { %v502_v53 = vadd.f32 %v472_v51, %v372_v49  ;;  %v889_v54 = vpop.f32.mrb[3].mxu0  ;;  %v506_v55 = vadd.f32 %v492_v52, %v376_v50  ;;  %v901_v56 = vpop.f32.mrb[3].mxu1 }
 0x12b   : > { %v692_v56 = vld [vmem:[%s1347_s5 + $0x30] sm:$0x3] (!%p808_p13) }
 0x12c   : > { %510 = vst.msk [vmem:[#allocation2 + $0x8] sm:$0xff] %vm508_vm3, %v502_v53  ;;  %514 = vst.msk [vmem:[#allocation2 + $0x28] sm:$0xff] %vm508_vm3, %v506_v55  ;;  %v688_v55 = vld [vmem:[%s1347_s5 + $0x10] sm:$0xff] (!%p808_p13) }
 0x12d   : > { %v477_v59 = vpop.f32.mrb[4].mxu0  ;;  %v497_v60 = vpop.f32.mrb[4].mxu1 }
 0x12e   : > { %v503_v61 = vadd.f32 %v477_v59, %v373_v57  ;;  %v892_v62 = vpop.f32.mrb[5].mxu0  ;;  %v507_v63 = vadd.f32 %v497_v60, %v377_v58  ;;  %v904_v0 = vpop.f32.mrb[5].mxu1  ;;  %520 = sbr.rel (%p808_p13) target bundleno = 537 (0x219), region = 90 }
 0x12f   : > { %v521_v10 = vld [vmem:[#allocation2] sm:$0xff] (!%p808_p13) }
 0x130   : > { %511 = vst.msk [vmem:[#allocation2 + $0x10] sm:$0xff] %vm508_vm3, %v503_v61  ;;  %v525_v11 = vld [vmem:[#allocation2 + $0x20] sm:$0xff] (!%p808_p13)  ;;  %910 = vmatmul.mubr.msk.f32.vlgmr.msra.gmra.mrb[0].mxu0 (!%p808_p13), %vm508_vm3, %v521_v10 }
 0x131   : > { %516 = vst.msk [vmem:[#allocation2 + $0x30] sm:$0x3] %vm515_vm4, %v507_v63  ;;  %v482_v2 = vpop.f32.mrb[6].mxu0  ;;  %922 = vmatmul.mubr.msk.f32.vlgmr.msra.gmra.mrb[0].mxu1 (!%p808_p13), %vm508_vm3, %v525_v11  ;;  %912 = vmatprep.mubr.msk.f32.mxu0 (!%p808_p13), %vm1102_vm5, %v1103_v9 }
 0x132   : > { %v504_v3 = vadd.f32 %v482_v2, %v374_v1  ;;  %v895_v4 = vpop.f32.mrb[7].mxu0  ;;  %924 = vmatprep.mubr.msk.f32.mxu1 (!%p808_p13), %vm1102_vm5, %v1103_v9  ;;  %v689_v1 = vld [vmem:[%s1347_s5 + $0x18] sm:$0xff] (!%p808_p13) }
 0x133   : > { %v522_v12 = vld [vmem:[#allocation2 + $0x8] sm:$0xff] (!%p808_p13) }
 0x134   : > { %512 = vst.msk [vmem:[#allocation2 + $0x18] sm:$0xff] %vm508_vm3, %v504_v3  ;;  %v526_v13 = vld [vmem:[#allocation2 + $0x28] sm:$0xff] (!%p808_p13)  ;;  %913 = vmatmul.mubr.msk.f32.gmra.mrb[2].mxu0 (!%p808_p13), %vm508_vm3, %v522_v12 }
 0x135   : > { %925 = vmatmul.mubr.msk.f32.gmra.mrb[2].mxu1 %vm508_vm3, %v526_v13  ;;  %915 = vmatprep.mubr.msk.f32.mxu0 %vm1102_vm5, %v1103_v9 }
 0x136   : > { %927 = vmatprep.mubr.msk.f32.mxu1 %vm1102_vm5, %v1103_v9 }
 0x137   : > { %v523_v14 = vld [vmem:[#allocation2 + $0x10] sm:$0xff] }
 0x138   : > { %v527_v15 = vld [vmem:[#allocation2 + $0x30] sm:$0x3]  ;;  %916 = vmatmul.mubr.msk.f32.gmra.mrb[4].mxu0 %vm508_vm3, %v523_v14 }
 0x139   : > { %928 = vmatmul.mubr.msk.f32.gmra.mrb[4].mxu1 %vm508_vm3, %v527_v15  ;;  %918 = vmatprep.mubr.msk.f32.mxu0 %vm1102_vm5, %v1103_v9 }
 0x13b   : > { %v524_v16 = vld [vmem:[#allocation2 + $0x18] sm:$0xff] }
 0x13c   : > { %919 = vmatmul.mubr.msk.f32.gmra.mrb[6].mxu0 %vm508_vm3, %v524_v16 }
 0x203   : > { %v617_v18 = vpop.f32.mrb[0].mxu0 }
 0x204   : > { %v637_v20 = vpop.f32.mrb[0].mxu1  ;;  %v658_v21 = vmul.f32 %v816_v17, %v617_v18  ;;  %v911_v22 = vpop.f32.mrb[1].mxu0 }
 0x205   : > { %v662_v23 = vmul.f32 %v816_v17, %v637_v20  ;;  %v923_v24 = vpop.f32.mrb[1].mxu1 }
 0x206   : > { %v672_v25 = vadd.f32 %v817_v19, %v658_v21 }
 0x207   : > { %v676_v26 = vadd.f32 %v817_v19, %v662_v23  ;;  %v622_v29 = vpop.f32.mrb[2].mxu0 }
 0x208   : > { %v642_v30 = vpop.f32.mrb[2].mxu1  ;;  %v679_v31 = vmax.f32 %v672_v25, 0.0  ;;  %v659_v33 = vmul.f32 %v816_v17, %v622_v29  ;;  %v914_v34 = vpop.f32.mrb[3].mxu0 }
 0x209   : > { %v683_v32 = vmax.f32 %v676_v26, 0.0  ;;  %v663_v35 = vmul.f32 %v816_v17, %v642_v30  ;;  %v926_v36 = vpop.f32.mrb[3].mxu1 }
 0x20a   : > { %v693_v37 = vmul.f32 %v686_v27, %v679_v31  ;;  %v673_v39 = vadd.f32 %v817_v19, %v659_v33 }
 0x20b   : > { %v697_v38 = vmul.f32 %v690_v28, %v683_v32  ;;  %v677_v40 = vadd.f32 %v817_v19, %v663_v35  ;;  %v627_v43 = vpop.f32.mrb[4].mxu0 }
 0x20c   : > { %v647_v44 = vpop.f32.mrb[4].mxu1  ;;  %700 = vst.msk [vmem:[%s1205_s11] sm:$0xff] %vm508_vm3, %v693_v37  ;;  %v680_v45 = vmax.f32 %v673_v39, 0.0  ;;  %v660_v47 = vmul.f32 %v816_v17, %v627_v43  ;;  %v917_v48 = vpop.f32.mrb[5].mxu0 }
 0x20d   : > { %704 = vst.msk [vmem:[%s1205_s11 + $0x20] sm:$0xff] %vm508_vm3, %v697_v38  ;;  %v684_v46 = vmax.f32 %v677_v40, 0.0  ;;  %v664_v49 = vmul.f32 %v816_v17, %v647_v44  ;;  %v929_v50 = vpop.f32.mrb[5].mxu1 }
 0x20e   : > { %v694_v51 = vmul.f32 %v687_v41, %v680_v45  ;;  %v674_v53 = vadd.f32 %v817_v19, %v660_v47 }
 0x20f   : > { %v698_v52 = vmul.f32 %v691_v42, %v684_v46  ;;  %v678_v54 = vadd.f32 %v817_v19, %v664_v49  ;;  %v632_v57 = vpop.f32.mrb[6].mxu0 }
 0x210   : > { %701 = vst.msk [vmem:[%s1205_s11 + $0x8] sm:$0xff] %vm508_vm3, %v694_v51  ;;  %v681_v58 = vmax.f32 %v674_v53, 0.0  ;;  %v661_v60 = vmul.f32 %v816_v17, %v632_v57  ;;  %v920_v61 = vpop.f32.mrb[7].mxu0 }
 0x211   : > { %705 = vst.msk [vmem:[%s1205_s11 + $0x28] sm:$0xff] %vm508_vm3, %v698_v52  ;;  %v685_v59 = vmax.f32 %v678_v54, 0.0 }
 0x212   : > { %v695_v62 = vmul.f32 %v688_v55, %v681_v58  ;;  %v675_v0 = vadd.f32 %v817_v19, %v661_v60 }
 0x213   : > { %v699_v63 = vmul.f32 %v692_v56, %v685_v59 }
 0x214   : > { %702 = vst.msk [vmem:[%s1205_s11 + $0x10] sm:$0xff] %vm508_vm3, %v695_v62  ;;  %v682_v2 = vmax.f32 %v675_v0, 0.0 }
 0x215   : > { %706 = vst.msk [vmem:[%s1205_s11 + $0x30] sm:$0x3] %vm515_vm4, %v699_v63 }
 0x216   : > { %v696_v3 = vmul.f32 %v689_v1, %v682_v2 }
 0x218   : > { %703 = vst.msk [vmem:[%s1205_s11 + $0x18] sm:$0xff] %vm508_vm3, %v696_v3 }
 0x219 PF: > { %s16_s27 = sadd.s32 1, %s1095_s27   ;;  %s1349_s21 = smov %s1075_s22 }
 0x21a   : > { %p13_p0 = scmp.ge.s32.totalorder %s16_s27, 6   ;;  %s1350_s22 = smov %s1188_s8 }
 0x21b   : > { %s1351_s23 = smov %s1087_s25  ;;  %s1352_s24 = smov %s1091_s26 }
 0x21c   : > { %s1353_s25 = smov %s1356_s28  ;;  %s1354_s26 = smov %s1360_s29 }
 0x21d   :  { %15 = sbr.rel (!%p13_p0) target bundleno = 4 (0x4), region = 128 }

</bundles_post_ra>
